<compile_context>
chip_gen: v7x
topology: tpu7x:2x2x1
jax: 0.10.0
libtpu: 0.0.40
codegen_flags: <defaults>
</compile_context>

<pallas_src>
import functools

import jax
import jax.numpy as jnp
from jax.experimental import pallas as pl
from jax.experimental.pallas import tpu as pltpu

HIDDEN = 256

_SINGLE_TC_TM_CAP = 2048   # v5e/v6e: 128 MiB physical VMEM -> fewest, biggest blocks
_MULTI_TC_TM_CAP = 1024    # v7x: 64 MiB VMEM per TC -> keep tiles modest


def value_function_kernel(x_ref, w1_ref, b1_ref, w2_ref, b2_ref, w3r_ref, b3_ref, o_ref,
                          *, compute_dtype):
    # Layer 1: cast activations/weights to the MXU compute dtype in-kernel (no-op for f32),
    # accumulate in f32; bias + ReLU on the f32 VPU path.
    x = x_ref[...].astype(compute_dtype)
    w1 = w1_ref[...].astype(compute_dtype)
    h1 = jnp.dot(x, w1, preferred_element_type=jnp.float32)
    h1 = jnp.maximum(h1 + b1_ref[...], 0.0)

    # Layer 2: MXU matmul, f32 accumulate.
    w2 = w2_ref[...].astype(compute_dtype)
    h2 = jnp.dot(h1.astype(compute_dtype), w2, preferred_element_type=jnp.float32)
    h2 = jnp.maximum(h2 + b2_ref[...], 0.0)

    # Layer 3 (256 -> 1): VPU multiply + lane reduction (no full-tile transpose, no 1-column
    # MXU matmul).  Output block is (tm, 1) f32.
    v = jnp.sum(h2 * w3r_ref[...], axis=-1, keepdims=True) + b3_ref[0]
    o_ref[...] = v.astype(o_ref.dtype)


def _cdiv(a, b):
    return -(-a // b)


def _round_up(x, m):
    return _cdiv(x, m) * m


def _tpu_num_tensorcores():
    """TensorCores addressable by one kernel launch (megacore / v7x -> 2, else 1)."""
    try:
        kind = jax.devices()[0].device_kind.lower()
    except Exception:
        return 1
    if any(tag in kind for tag in ("v7", "7x", "v4", "v5p", "v5 p")):
        return 2
    return 1


def _default_tm(batch, num_tc):
    if num_tc <= 1:
        # Single TC (v5e/v6e): fewest, biggest blocks; per-step overhead dominates this MLP.
        return batch if batch <= _SINGLE_TC_TM_CAP else _SINGLE_TC_TM_CAP
    # Multi TC (v7x / megacore): even, balanced block count -> wall = num_blocks / num_tc steps.
    n = max(num_tc, _cdiv(batch, _MULTI_TC_TM_CAP))
    if n % num_tc:
        n += num_tc - (n % num_tc)
    return max(8, _round_up(_cdiv(batch, n), 8))


@functools.partial(jax.jit, static_argnames=("tm", "compute_dtype"))
def value_function(state, w1, b1, w2, b2, w3, b3, *, tm=None, compute_dtype=jnp.bfloat16):
    B, state_dim = state.shape
    assert w1.shape == (state_dim, HIDDEN), w1.shape
    assert w2.shape == (HIDDEN, HIDDEN), w2.shape
    assert w3.size == HIDDEN, "w3 must be the (256, 1) head weight stored (in, out)"

    if tm is None:
        tm = _default_tm(B, _tpu_num_tensorcores())
    tm = min(tm, _round_up(B, 8))
    if tm != B:
        tm = _round_up(tm, 8)     # tiled / partial blocks need a sublane-aligned tile
    num_blocks = pl.cdiv(B, tm)

    # Tiny parameter re-layouts (a few hundred floats each); the batch-sized `state` itself is
    # passed through untouched -- no wrapper-side cast or pad over the batch.
    b1f = b1.reshape(1, HIDDEN).astype(jnp.float32)
    b2f = b2.reshape(1, HIDDEN).astype(jnp.float32)
    w3r = w3.reshape(1, HIDDEN).astype(jnp.float32)   # (in, 1) head -> lane-dense (1, 256) row
    b3s = b3.reshape(-1).astype(jnp.float32)          # (1,) scalar, lives in SMEM

    flops = 2 * B * (state_dim * HIDDEN + HIDDEN * HIDDEN + HIDDEN)
    bytes_accessed = 4 * (B * state_dim + state_dim * HIDDEN + HIDDEN * HIDDEN
                          + 3 * HIDDEN + 1 + B)
    # Very large blocks only occur on single-TC chips (128 MiB physical VMEM); raise the scoped
    # limit there so the f32 intermediates (~tm*256*4 B each) fit without re-tiling.
    vmem_limit = 64 * 1024 * 1024 if tm >= 2048 else None

    kernel = functools.partial(value_function_kernel, compute_dtype=compute_dtype)
    return pl.pallas_call(
        kernel,
        out_shape=jax.ShapeDtypeStruct((B, 1), jnp.float32),
        grid_spec=pltpu.PrefetchScalarGridSpec(
            num_scalar_prefetch=0,
            grid=(num_blocks,),
            in_specs=[
                pl.BlockSpec((tm, state_dim), lambda i: (i, 0)),       # state tile (f32)
                pl.BlockSpec((state_dim, HIDDEN), lambda i: (0, 0)),   # W1, resident
                pl.BlockSpec((1, HIDDEN), lambda i: (0, 0)),           # b1
                pl.BlockSpec((HIDDEN, HIDDEN), lambda i: (0, 0)),      # W2, resident
                pl.BlockSpec((1, HIDDEN), lambda i: (0, 0)),           # b2
                pl.BlockSpec((1, HIDDEN), lambda i: (0, 0)),           # W3 as a (1, 256) row
                pl.BlockSpec(memory_space=pltpu.MemorySpace.SMEM),     # b3 scalar
            ],
            out_specs=pl.BlockSpec((tm, 1), lambda i: (i, 0)),
        ),
        compiler_params=pltpu.CompilerParams(
            dimension_semantics=("parallel",),
            vmem_limit_bytes=vmem_limit),
        cost_estimate=pl.CostEstimate(
            flops=flops, transcendentals=0, bytes_accessed=bytes_accessed),
    )(state, w1, b1f, w2, b2f, w3r, b3s)


def init_params(key, state_dim):
    """Deterministic PyTorch-style (Kaiming-uniform-ish) init. Weights stored (in, out)."""
    dims = [state_dim, HIDDEN, HIDDEN, 1]
    params = []
    for i in range(len(dims) - 1):
        fan_in, fan_out = dims[i], dims[i + 1]
        key, kw, kb = jax.random.split(key, 3)
        bound = 1.0 / jnp.sqrt(fan_in)
        w = jax.random.uniform(kw, (fan_in, fan_out), jnp.float32, -bound, bound)
        b = jax.random.uniform(kb, (1, fan_out), jnp.float32, -bound, bound)
        params += [w, b]
    return params


def value_function_ref(state, w1, b1, w2, b2, w3, b3):
    hi = jax.lax.Precision.HIGHEST
    h1 = jnp.maximum(jnp.dot(state, w1, precision=hi) + b1, 0.0)
    h2 = jnp.maximum(jnp.dot(h1, w2, precision=hi) + b2, 0.0)
    return jnp.dot(h2, w3, precision=hi) + b3


if __name__ == "__main__":
    key = jax.random.PRNGKey(0)
    state_dim = 32
    batch = 8

    k_state, k_params = jax.random.split(key)
    state = jax.random.normal(k_state, (batch, state_dim), jnp.float32)
    params = init_params(k_params, state_dim)

    ref = value_function_ref(state, *params)

    # f32 compute path: tight check against the high-precision reference.
    out_f32 = jax.block_until_ready(value_function(state, *params, compute_dtype=jnp.float32))
    assert out_f32.shape == (batch, 1), out_f32.shape
    assert jnp.allclose(out_f32, ref, atol=1e-3, rtol=1e-3), "f32 path mismatch vs reference"

    # Default bf16 MXU path: loose check (bf16 matmul inputs, f32 accumulation).
    out = jax.block_until_ready(value_function(state, *params))
    assert out.shape == (batch, 1), out.shape
    assert jnp.allclose(out, ref, atol=5e-2, rtol=5e-2), "bf16 path mismatch vs reference"

    print("KERNEL_OK")
</pallas_src>

<mosaic_0001>
module attributes {stable_mosaic.version = 11 : i64} {
  func.func @value_function_kernel(%arg0: i32, %arg1: memref<8x32xf32, #tpu.memory_space<vmem>>, %arg2: memref<32x256xf32, #tpu.memory_space<vmem>>, %arg3: memref<1x256xf32, #tpu.memory_space<vmem>>, %arg4: memref<256x256xf32, #tpu.memory_space<vmem>>, %arg5: memref<1x256xf32, #tpu.memory_space<vmem>>, %arg6: memref<1x256xf32, #tpu.memory_space<vmem>>, %arg7: memref<1xf32, #tpu.memory_space<smem>>, %arg8: memref<8x1xf32, #tpu.memory_space<vmem>>) attributes {dimension_semantics = [#tpu.dimension_semantics<parallel>], iteration_bounds = array<i64: 1>, scalar_prefetch = 0 : i64, scratch_operands = 0 : i64, tpu.core_type = #tpu.core_type<tc>, window_params = [{transform_indices = @transform_0, window_bounds = array<i64: 8, 32>}, {pipeline_mode = #tpu.pipeline_mode<synchronous>, transform_indices = @transform_1, window_bounds = array<i64: 32, 256>}, {pipeline_mode = #tpu.pipeline_mode<synchronous>, transform_indices = @transform_2, window_bounds = array<i64: 1, 256>}, {pipeline_mode = #tpu.pipeline_mode<synchronous>, transform_indices = @transform_3, window_bounds = array<i64: 256, 256>}, {pipeline_mode = #tpu.pipeline_mode<synchronous>, transform_indices = @transform_4, window_bounds = array<i64: 1, 256>}, {pipeline_mode = #tpu.pipeline_mode<synchronous>, transform_indices = @transform_5, window_bounds = array<i64: 1, 256>}, {transform_indices = @transform_6, window_bounds = array<i64: 1>}, {transform_indices = @transform_7, window_bounds = array<i64: 8, 1>}]} {
    %c0 = arith.constant 0 : index
    %c0_0 = arith.constant 0 : index
    %0 = vector.load %arg1[%c0, %c0_0] : memref<8x32xf32, #tpu.memory_space<vmem>>, vector<8x32xf32>
    %c0_1 = arith.constant 0 : index
    %c0_2 = arith.constant 0 : index
    %1 = vector.load %arg2[%c0_1, %c0_2] : memref<32x256xf32, #tpu.memory_space<vmem>>, vector<32x256xf32>
    %cst = arith.constant dense<0.000000e+00> : vector<8x256xf32>
    %2 = tpu.matmul %0, %1, %cst {dimension_numbers = #tpu.dot_dimension_numbers<[1], [0], [0], [1], [0, 0, 1, 1], [], []>} : vector<8x32xf32>, vector<32x256xf32>, vector<8x256xf32> -> vector<8x256xf32>
    %c0_3 = arith.constant 0 : index
    %c0_4 = arith.constant 0 : index
    %3 = vector.load %arg3[%c0_3, %c0_4] : memref<1x256xf32, #tpu.memory_space<vmem>>, vector<1x256xf32>
    %4 = vector.broadcast %3 : vector<1x256xf32> to vector<8x256xf32>
    %5 = arith.addf %2, %4 : vector<8x256xf32>
    %cst_5 = arith.constant 0.000000e+00 : f32
    %6 = vector.broadcast %cst_5 : f32 to vector<8x256xf32>
    %7 = arith.maximumf %5, %6 : vector<8x256xf32>
    %c0_6 = arith.constant 0 : index
    %c0_7 = arith.constant 0 : index
    %8 = vector.load %arg4[%c0_6, %c0_7] : memref<256x256xf32, #tpu.memory_space<vmem>>, vector<256x256xf32>
    %cst_8 = arith.constant dense<0.000000e+00> : vector<8x256xf32>
    %9 = tpu.matmul %7, %8, %cst_8 {dimension_numbers = #tpu.dot_dimension_numbers<[1], [0], [0], [1], [0, 0, 1, 1], [], []>} : vector<8x256xf32>, vector<256x256xf32>, vector<8x256xf32> -> vector<8x256xf32>
    %c0_9 = arith.constant 0 : index
    %c0_10 = arith.constant 0 : index
    %10 = vector.load %arg5[%c0_9, %c0_10] : memref<1x256xf32, #tpu.memory_space<vmem>>, vector<1x256xf32>
    %11 = vector.broadcast %10 : vector<1x256xf32> to vector<8x256xf32>
    %12 = arith.addf %9, %11 : vector<8x256xf32>
    %cst_11 = arith.constant 0.000000e+00 : f32
    %13 = vector.broadcast %cst_11 : f32 to vector<8x256xf32>
    %14 = arith.maximumf %12, %13 : vector<8x256xf32>
    %c0_12 = arith.constant 0 : index
    %c0_13 = arith.constant 0 : index
    %15 = vector.load %arg6[%c0_12, %c0_13] : memref<1x256xf32, #tpu.memory_space<vmem>>, vector<1x256xf32>
    %16 = vector.broadcast %15 : vector<1x256xf32> to vector<8x256xf32>
    %17 = arith.mulf %14, %16 : vector<8x256xf32>
    %cst_14 = arith.constant dense<0.000000e+00> : vector<8xf32>
    %18 = vector.multi_reduction <add>, %17, %cst_14 [1] : vector<8x256xf32> to vector<8xf32>
    %19 = vector.shape_cast %18 : vector<8xf32> to vector<8x1xf32>
    %c0_15 = arith.constant 0 : index
    %20 = memref.load %arg7[%c0_15] : memref<1xf32, #tpu.memory_space<smem>>
    %21 = vector.broadcast %20 : f32 to vector<8x1xf32>
    %22 = arith.addf %19, %21 : vector<8x1xf32>
    %c0_16 = arith.constant 0 : index
    %c0_17 = arith.constant 0 : index
    %23 = vector.load %arg8[%c0_16, %c0_17] : memref<8x1xf32, #tpu.memory_space<vmem>>, vector<8x1xf32>
    tpu.vector_store %arg8[%c0_16, %c0_17], %22 {strides = array<i32>} : memref<8x1xf32, #tpu.memory_space<vmem>>, vector<8x1xf32>,
    return
  }
  func.func @transform_0(%arg0: i32) -> (i32, i32) {
    %c0_i32 = arith.constant 0 : i32
    %c0_i32_0 = arith.constant 0 : i32
    return %arg0, %c0_i32 : i32, i32
  }
  func.func @transform_1(%arg0: i32) -> (i32, i32) {
    %c0_i32 = arith.constant 0 : i32
    %c0_i32_0 = arith.constant 0 : i32
    %c0_i32_1 = arith.constant 0 : i32
    return %c0_i32, %c0_i32_0 : i32, i32
  }
  func.func @transform_2(%arg0: i32) -> (i32, i32) {
    %c0_i32 = arith.constant 0 : i32
    %c0_i32_0 = arith.constant 0 : i32
    %c0_i32_1 = arith.constant 0 : i32
    return %c0_i32, %c0_i32_0 : i32, i32
  }
  func.func @transform_3(%arg0: i32) -> (i32, i32) {
    %c0_i32 = arith.constant 0 : i32
    %c0_i32_0 = arith.constant 0 : i32
    %c0_i32_1 = arith.constant 0 : i32
    return %c0_i32, %c0_i32_0 : i32, i32
  }
  func.func @transform_4(%arg0: i32) -> (i32, i32) {
    %c0_i32 = arith.constant 0 : i32
    %c0_i32_0 = arith.constant 0 : i32
    %c0_i32_1 = arith.constant 0 : i32
    return %c0_i32, %c0_i32_0 : i32, i32
  }
  func.func @transform_5(%arg0: i32) -> (i32, i32) {
    %c0_i32 = arith.constant 0 : i32
    %c0_i32_0 = arith.constant 0 : i32
    %c0_i32_1 = arith.constant 0 : i32
    return %c0_i32, %c0_i32_0 : i32, i32
  }
  func.func @transform_6(%arg0: i32) -> i32 {
    %c0_i32 = arith.constant 0 : i32
    %c0_i32_0 = arith.constant 0 : i32
    return %c0_i32 : i32
  }
  func.func @transform_7(%arg0: i32) -> (i32, i32) {
    %c0_i32 = arith.constant 0 : i32
    %c0_i32_0 = arith.constant 0 : i32
    return %arg0, %c0_i32 : i32, i32
  }
}

</mosaic_0001>

<bundles_post_ra>
// kernel: value_function.1
= control target key start
LH: loop header
LB: loop body
LE: loop exit
PB: predicated region body
PF: predicated region fallthrough
CT: control target
= control target key end

     0   :  { %13 = vsyncpa [#allocation4], 0  ;;  %s543_s0 = inlined_call_operand.vmem [shape: f32[8,32], index: 0, kind: input, shape index: {}]   ;;  %s544_s1 = inlined_call_operand.hbm [shape: f32[32,256], index: 1, kind: input, shape index: {}]   ;;  %s545_s2 = inlined_call_operand.vmem [shape: f32[1,256], index: 2, kind: input, shape index: {}]   ;;  %s546_s3 = inlined_call_operand.hbm [shape: f32[256,256], index: 3, kind: input, shape index: {}]   ;;  %s547_s4 = inlined_call_operand.vmem [shape: f32[1,256], index: 4, kind: input, shape index: {}]   ;;  %s548_s5 = inlined_call_operand.vmem [shape: f32[1,256], index: 5, kind: input, shape index: {}]   ;;  %s549_s6 = inlined_call_operand.<no memory space> [shape: f32[1], index: 6, kind: input, shape index: {}]   ;;  %s550_s7 = inlined_call_operand.vmem [shape: f32[8,1], index: 7, kind: output, shape index: {}]  }
   0x1   :  { %14 = vsyncpa [#allocation6], 0  ;;  %s456_s24 = smov [#allocation3]   ;;  %s408_s28 = scalar_lea.hbm %s544_s1, 1024 }
   0x2   :  { %s22_s25 = sshll.u32 %s456_s24, 4  ;;  %p409_p0 = scmp.ne.s32.totalorder %s544_s1, %s408_s28  ;;  %s23_s25 = int_to_ptr.vmem [resolvable:$true] %s22_s25 }
   0x3   :  { %p412_p1 = scmp.lt.u32.totalorder %s408_s28, %s544_s1 }
   0x5   :  { %p414_p2 = pnand %p412_p1, %p409_p0 }
   0x7   :  { %417 = shalt.err (!%p414_p2)
}
   0x8   :  { %s418_s10 = scalar_lea.vmem %s23_s25, 1024  ;;  %p423_p4 = scmp.lt.s32.totalorder %s23_s25, %s23_s25 }
   0x9   :  { %p419_p3 = scmp.ne.s32.totalorder %s23_s25, %s418_s10  ;;  %p424_p5 = scmp.lt.s32.totalorder %s418_s10, %s418_s10 }
   0xb   :  { %p425_p6 = por %p424_p5, %p423_p4 }
   0xd   :  { %p426_p7 = pnand %p425_p6, %p419_p3 }
   0xf   :  { %429 = shalt.err (!%p426_p7)
}
  0x10   :  { %s457_s11 = smov 256   ;;  %s458_s12 = smov 16  }
  0x11   :  { %28 = dma.hbm_to_vmem [thread:$0]  %s544_s1, 1024, %s23_s25, [#allocation4], %s457_s11, %s457_s11, %s458_s12  }
  0x12   :  { %s459_s15 = smov [#allocation5]   ;;  %s430_s19 = scalar_lea.hbm %s546_s3, 8192 }
  0x13   :  { %s36_s16 = sshll.u32 %s459_s15, 4  ;;  %p431_p8 = scmp.ne.s32.totalorder %s546_s3, %s430_s19  ;;  %s37_s16 = int_to_ptr.vmem [resolvable:$true] %s36_s16 }
  0x14   :  { %p434_p9 = scmp.lt.u32.totalorder %s430_s19, %s546_s3 }
  0x16   :  { %p436_p10 = pnand %p434_p9, %p431_p8 }
  0x18   :  { %439 = shalt.err (!%p436_p10)
}
  0x19   :  { %s440_s24 = scalar_lea.vmem %s37_s16, 8192  ;;  %p445_p12 = scmp.lt.s32.totalorder %s37_s16, %s37_s16 }
  0x1a   :  { %p441_p11 = scmp.ne.s32.totalorder %s37_s16, %s440_s24  ;;  %p446_p13 = scmp.lt.s32.totalorder %s440_s24, %s440_s24 }
  0x1c   :  { %p447_p0 = por %p446_p13, %p445_p12 }
  0x1e   :  { %p448_p1 = pnand %p447_p0, %p441_p11 }
  0x20   :  { %451 = shalt.err (!%p448_p1)
}
  0x21   :  { %42 = dma.hbm_to_vmem [thread:$0]  %s546_s3, 8192, %s37_s16, [#allocation6], %s457_s11, %s457_s11, %s458_s12  }
  0x22   :  { %452 = dma.done.wait [#allocation4], 1024  }
  0x23   :  { %453 = vsyncadd [#allocation4], 4294966272 }
  0x24   :  { %454 = dma.done.wait [#allocation6], 8192  }
  0x25   :  { %455 = vsyncadd [#allocation6], 4294959104  ;;  %v460_v0 = vmov 0.0   ;;  %v57_v1 = vld [vmem:[#allocation3 + $0x8] sm:$0xff]  ;;  %v59_v2 = vld [vmem:[#allocation3 + $0x18] sm:$0xff]  ;;  %vm76_vm0 = vcmask 261120  }
  0x26   :  { %144 = vmatprep.mubr.f32.mxu0 %v460_v0  ;;  %v56_v3 = vld [vmem:[#allocation3] sm:$0xff]  ;;  %v331_v4 = vpack.c.bf16 %v59_v2, %v57_v1  ;;  %v58_v5 = vld [vmem:[#allocation3 + $0x10] sm:$0xff]  ;;  %v61_v6 = vld [vmem:[#allocation3 + $0x28] sm:$0xff]  ;;  %vm322_vm1 = vcmask 7168  }
  0x27   :  { %v63_v7 = vld [vmem:[#allocation3 + $0x38] sm:$0xff]  ;;  %v333_v8 = vpack.c.bf16 %v58_v5, %v56_v3  ;;  %v60_v10 = vld [vmem:[#allocation3 + $0x20] sm:$0xff]  ;;  %v62_v11 = vld [vmem:[#allocation3 + $0x30] sm:$0xff] }
  0x28   :  { %v335_v9 = vpack.c.bf16 %v63_v7, %v61_v6  ;;  %332 = vmatprep.subr.bf16.mxu0 %v331_v4  ;;  %v154_v12 = vld [vmem:[#allocation5 + $0x8] sm:$0xff]  ;;  %v156_v13 = vld [vmem:[#allocation5 + $0x18] sm:$0xff]  ;;  %v153_v14 = vld [vmem:[#allocation5] sm:$0xff]  ;;  %v337_v15 = vpack.c.bf16 %v62_v11, %v60_v10 }
  0x29   :  { %334 = vmatpush1.bf16.msra.mxu0 %v333_v8  ;;  %v339_v16 = vpack.c.bf16 %v156_v13, %v154_v12  ;;  %v155_v17 = vld [vmem:[#allocation5 + $0x10] sm:$0xff]  ;;  %v158_v18 = vld [vmem:[#allocation5 + $0x28] sm:$0xff]  ;;  %v160_v19 = vld [vmem:[#allocation5 + $0x38] sm:$0xff] }
  0x2a   :  { %336 = vmatprep.subr.bf16.mxu0 %v335_v9  ;;  %v341_v20 = vpack.c.bf16 %v155_v17, %v153_v14  ;;  %v343_v21 = vpack.c.bf16 %v160_v19, %v158_v18  ;;  %v157_v22 = vld [vmem:[#allocation5 + $0x20] sm:$0xff]  ;;  %v159_v23 = vld [vmem:[#allocation5 + $0x30] sm:$0xff]  ;;  %v162_v24 = vld [vmem:[#allocation5 + $0x48] sm:$0xff] }
  0x2b   :  { %340 = vmatprep.subr.bf16.mxu1 %v339_v16  ;;  %v164_v25 = vld [vmem:[#allocation5 + $0x58] sm:$0xff]  ;;  %v345_v26 = vpack.c.bf16 %v159_v23, %v157_v22  ;;  %v55_v27 = vld [vmem:[%s543_s0] sm:$0xff]  ;;  %v163_v30 = vld [vmem:[#allocation5 + $0x50] sm:$0xff] }
  0x2c   :  { %342 = vmatpush1.bf16.msra.mxu1 %v341_v20  ;;  %v347_v28 = vpack.c.bf16 %v164_v25, %v162_v24  ;;  %v161_v29 = vld [vmem:[#allocation5 + $0x40] sm:$0xff]  ;;  %v166_v31 = vld [vmem:[#allocation5 + $0x68] sm:$0xff]  ;;  %v168_v32 = vld [vmem:[#allocation5 + $0x78] sm:$0xff] }
  0x2d   :  { %338 = vmatpush1.bf16.msra.mxu0 %v337_v15  ;;  %344 = vmatprep.subr.bf16.mxu1 %v343_v21  ;;  %v349_v33 = vpack.c.bf16 %v163_v30, %v161_v29  ;;  %v351_v34 = vpack.c.bf16 %v168_v32, %v166_v31  ;;  %v165_v35 = vld [vmem:[#allocation5 + $0x60] sm:$0xff]  ;;  %v167_v36 = vld [vmem:[#allocation5 + $0x70] sm:$0xff]  ;;  %v170_v37 = vld [vmem:[#allocation5 + $0x88] sm:$0xff] }
  0x2e   :  { %v172_v38 = vld [vmem:[#allocation5 + $0x98] sm:$0xff]  ;;  %v353_v39 = vpack.c.bf16 %v167_v36, %v165_v35  ;;  %v169_v41 = vld [vmem:[#allocation5 + $0x80] sm:$0xff]  ;;  %v171_v42 = vld [vmem:[#allocation5 + $0x90] sm:$0xff] }
  0x2f   :  { %v355_v40 = vpack.c.bf16 %v172_v38, %v170_v37  ;;  %v174_v43 = vld [vmem:[#allocation5 + $0xa8] sm:$0xff]  ;;  %v176_v44 = vld [vmem:[#allocation5 + $0xb8] sm:$0xff]  ;;  %v357_v45 = vpack.c.bf16 %v171_v42, %v169_v41  ;;  %v173_v47 = vld [vmem:[#allocation5 + $0xa0] sm:$0xff] }
  0x30   :  { %330 = vmatmul.mubr.msk.f32.vlgmr.msra.gmra.mrb[0].mxu0 %vm76_vm0, %v55_v27  ;;  %346 = vmatpush1.bf16.msra.mxu1 %v345_v26  ;;  %v359_v46 = vpack.c.bf16 %v176_v44, %v174_v43  ;;  %v175_v48 = vld [vmem:[#allocation5 + $0xb0] sm:$0xff]  ;;  %v178_v49 = vld [vmem:[#allocation5 + $0xc8] sm:$0xff]  ;;  %v180_v50 = vld [vmem:[#allocation5 + $0xd8] sm:$0xff] }
  0x31   :  { %348 = vmatprep.subr.bf16.mxu1 %v347_v28  ;;  %v361_v51 = vpack.c.bf16 %v175_v48, %v173_v47  ;;  %v363_v52 = vpack.c.bf16 %v180_v50, %v178_v49  ;;  %v177_v53 = vld [vmem:[#allocation5 + $0xc0] sm:$0xff]  ;;  %v179_v54 = vld [vmem:[#allocation5 + $0xd0] sm:$0xff]  ;;  %v182_v55 = vld [vmem:[#allocation5 + $0xe8] sm:$0xff] }
  0x32   :  { %v184_v56 = vld [vmem:[#allocation5 + $0xf8] sm:$0xff]  ;;  %v365_v57 = vpack.c.bf16 %v179_v54, %v177_v53  ;;  %v181_v59 = vld [vmem:[#allocation5 + $0xe0] sm:$0xff]  ;;  %v183_v60 = vld [vmem:[#allocation5 + $0xf0] sm:$0xff] }
  0x33   :  { %v367_v58 = vpack.c.bf16 %v184_v56, %v182_v55  ;;  %v186_v61 = vld [vmem:[#allocation5 + $0x108] sm:$0xff]  ;;  %v188_v62 = vld [vmem:[#allocation5 + $0x118] sm:$0xff]  ;;  %v369_v63 = vpack.c.bf16 %v183_v60, %v181_v59  ;;  %v185_v1 = vld [vmem:[#allocation5 + $0x100] sm:$0xff] }
  0x34   :  { %350 = vmatpush1.bf16.msra.mxu1 %v349_v33  ;;  %v371_v0 = vpack.c.bf16 %v188_v62, %v186_v61  ;;  %v187_v2 = vld [vmem:[#allocation5 + $0x110] sm:$0xff]  ;;  %v190_v3 = vld [vmem:[#allocation5 + $0x128] sm:$0xff]  ;;  %v192_v4 = vld [vmem:[#allocation5 + $0x138] sm:$0xff] }
  0x35   :  { %352 = vmatprep.subr.bf16.mxu1 %v351_v34  ;;  %v373_v5 = vpack.c.bf16 %v187_v2, %v185_v1  ;;  %v375_v6 = vpack.c.bf16 %v192_v4, %v190_v3  ;;  %v189_v7 = vld [vmem:[#allocation5 + $0x120] sm:$0xff]  ;;  %v191_v8 = vld [vmem:[#allocation5 + $0x130] sm:$0xff]  ;;  %v194_v9 = vld [vmem:[#allocation5 + $0x148] sm:$0xff] }
  0x36   :  { %v196_v10 = vld [vmem:[#allocation5 + $0x158] sm:$0xff]  ;;  %v377_v11 = vpack.c.bf16 %v191_v8, %v189_v7  ;;  %v193_v13 = vld [vmem:[#allocation5 + $0x140] sm:$0xff]  ;;  %v195_v14 = vld [vmem:[#allocation5 + $0x150] sm:$0xff] }
  0x37   :  { %v379_v12 = vpack.c.bf16 %v196_v10, %v194_v9  ;;  %v198_v15 = vld [vmem:[#allocation5 + $0x168] sm:$0xff]  ;;  %v200_v16 = vld [vmem:[#allocation5 + $0x178] sm:$0xff]  ;;  %v381_v17 = vpack.c.bf16 %v195_v14, %v193_v13  ;;  %v197_v19 = vld [vmem:[#allocation5 + $0x160] sm:$0xff]  ;;  %v320_v10 = vstv %s549_s6 }
  0x38   :  { %354 = vmatpush1.bf16.msra.mxu1 %v353_v39  ;;  %v383_v18 = vpack.c.bf16 %v200_v16, %v198_v15  ;;  %v199_v20 = vld [vmem:[#allocation5 + $0x170] sm:$0xff]  ;;  %v202_v21 = vld [vmem:[#allocation5 + $0x188] sm:$0xff]  ;;  %v204_v22 = vld [vmem:[#allocation5 + $0x198] sm:$0xff] }
  0x39   :  { %356 = vmatprep.subr.bf16.mxu1 %v355_v40  ;;  %v385_v23 = vpack.c.bf16 %v199_v20, %v197_v19  ;;  %v387_v24 = vpack.c.bf16 %v204_v22, %v202_v21  ;;  %v201_v25 = vld [vmem:[#allocation5 + $0x180] sm:$0xff]  ;;  %v203_v26 = vld [vmem:[#allocation5 + $0x190] sm:$0xff]  ;;  %v206_v27 = vld [vmem:[#allocation5 + $0x1a8] sm:$0xff] }
  0x3a   :  { %v208_v28 = vld [vmem:[#allocation5 + $0x1b8] sm:$0xff]  ;;  %v389_v29 = vpack.c.bf16 %v203_v26, %v201_v25  ;;  %v205_v31 = vld [vmem:[#allocation5 + $0x1a0] sm:$0xff]  ;;  %v207_v32 = vld [vmem:[#allocation5 + $0x1b0] sm:$0xff] }
  0x3b   :  { %v391_v30 = vpack.c.bf16 %v208_v28, %v206_v27  ;;  %v210_v33 = vld [vmem:[#allocation5 + $0x1c8] sm:$0xff]  ;;  %v212_v34 = vld [vmem:[#allocation5 + $0x1d8] sm:$0xff]  ;;  %v393_v35 = vpack.c.bf16 %v207_v32, %v205_v31  ;;  %v209_v37 = vld [vmem:[#allocation5 + $0x1c0] sm:$0xff] }
  0x3c   :  { %358 = vmatpush1.bf16.msra.mxu1 %v357_v45  ;;  %v395_v36 = vpack.c.bf16 %v212_v34, %v210_v33  ;;  %v211_v38 = vld [vmem:[#allocation5 + $0x1d0] sm:$0xff]  ;;  %v214_v40 = vld [vmem:[#allocation5 + $0x1e8] sm:$0xff]  ;;  %v216_v41 = vld [vmem:[#allocation5 + $0x1f8] sm:$0xff] }
  0x3d   :  { %360 = vmatprep.subr.bf16.mxu1 %v359_v46  ;;  %v397_v39 = vpack.c.bf16 %v211_v38, %v209_v37  ;;  %v399_v42 = vpack.c.bf16 %v216_v41, %v214_v40  ;;  %v213_v43 = vld [vmem:[#allocation5 + $0x1e0] sm:$0xff]  ;;  %v215_v44 = vld [vmem:[#allocation5 + $0x1f0] sm:$0xff]  ;;  %v66_v46 = vlaneseq }
  0x3e   :  { %v401_v45 = vpack.c.bf16 %v215_v44, %v213_v43  ;;  %v64_v49 = vld [vmem:[%s545_s2] sm:$0x3] }
  0x3f   :  { %v67_v47 = vshrl.u32 %v66_v46, 7  ;;  %v217_v59 = vld [vmem:[%s547_s4] sm:$0x3] }
  0x40   :  { %362 = vmatpush1.bf16.msra.mxu1 %v361_v51  ;;  %v302_v62 = vld [vmem:[%s548_s5] sm:$0x3] }
  0x41   :  { %364 = vmatprep.subr.bf16.mxu1 %v363_v52  ;;  %v68_v48 = vsub.s32 0, %v67_v47  ;;  %v72_v50 = vsub.s32 1, %v67_v47 }
  0x43   :  { %v69_v51 = vrot.slane %v64_v49, %v68_v48  ;;  %v73_v52 = vrot.slane %v64_v49, %v72_v50  ;;  %v222_v60 = vrot.slane %v217_v59, %v68_v48  ;;  %v226_v61 = vrot.slane %v217_v59, %v72_v50 }
  0x44   :  { %366 = vmatpush1.bf16.msra.mxu1 %v365_v57  ;;  %v307_v2 = vrot.slane %v302_v62, %v68_v48  ;;  %v311_v4 = vrot.slane %v302_v62, %v72_v50 }
  0x45   :  { %368 = vmatprep.subr.bf16.mxu1 %v367_v58 }
  0x48   :  { %370 = vmatpush1.bf16.msra.mxu1 %v369_v63 }
  0x49   :  { %372 = vmatprep.subr.bf16.mxu1 %v371_v0 }
  0x4c   :  { %374 = vmatpush1.bf16.msra.mxu1 %v373_v5 }
  0x4d   :  { %376 = vmatprep.subr.bf16.mxu1 %v375_v6 }
  0x50   :  { %378 = vmatpush1.bf16.msra.mxu1 %v377_v11 }
  0x51   :  { %380 = vmatprep.subr.bf16.mxu1 %v379_v12 }
  0x54   :  { %382 = vmatpush1.bf16.msra.mxu1 %v381_v17 }
  0x55   :  { %384 = vmatprep.subr.bf16.mxu1 %v383_v18 }
  0x58   :  { %386 = vmatpush1.bf16.msra.mxu1 %v385_v23 }
  0x59   :  { %388 = vmatprep.subr.bf16.mxu1 %v387_v24 }
  0x5c   :  { %390 = vmatpush1.bf16.msra.mxu1 %v389_v29 }
  0x5d   :  { %392 = vmatprep.subr.bf16.mxu1 %v391_v30 }
  0x60   :  { %394 = vmatpush1.bf16.msra.mxu1 %v393_v35 }
  0x61   :  { %396 = vmatprep.subr.bf16.mxu1 %v395_v36 }
  0x64   :  { %398 = vmatpush1.bf16.msra.mxu1 %v397_v39 }
  0x65   :  { %400 = vmatprep.subr.bf16.mxu1 %v399_v42 }
  0x68   :  { %402 = vmatpush1.bf16.msra.mxu1 %v401_v45 }
 0x103   :  { %v146_v53 = vpop.f32.mrb[0].mxu0 }
 0x104   :  { %v147_v54 = vadd.f32 %v146_v53, %v69_v51  ;;  %v148_v55 = vpop.f32.mrb[1].mxu0 }
 0x105   :  { %v149_v56 = vadd.f32 %v148_v55, %v73_v52 }
 0x106   :  { %v151_v58 = vmax.f32 %v147_v54, 0.0 }
 0x107   :  { %v152_v57 = vmax.f32 %v149_v56, 0.0 }
 0x109   :  { %293 = vmatprep.mubr.f32.mxu1 %v152_v57 }
 0x10a   :  { %294 = vmatmul.mubr.f32.vlgmr.msra.gmra.mrb[0].mxu1 %v151_v58 }
 0x1dd   :  { %v295_v63 = vpop.f32.mrb[0].mxu1 }
 0x1de   :  { %v296_v0 = vadd.f32 %v295_v63, %v222_v60  ;;  %v297_v1 = vpop.f32.mrb[1].mxu1 }
 0x1df   :  { %v298_v3 = vadd.f32 %v297_v1, %v226_v61 }
 0x1e0   :  { %v300_v5 = vmax.f32 %v296_v0, 0.0 }
 0x1e1   :  { %v301_v6 = vmax.f32 %v298_v3, 0.0 }
 0x1e2   :  { %v314_v7 = vmul.f32 %v307_v2, %v300_v5 }
 0x1e3   :  { %v315_v8 = vmul.f32 %v311_v4, %v301_v6 }
 0x1e5   :  { %v316_v9 = vadd.f32 %v315_v8, %v314_v7 }
 0x1e7   :  { %317 = vadd.xlane.f32.xlu0 %v316_v9 }
 0x274   :  { %v318_v11 = vpop.xlane.xlu0 %317 }
 0x275   :  { %v321_v12 = vadd.f32 %v320_v10, %v318_v11 }
 0x277   :  { %323 = vst.msk [vmem:[%s550_s7] sm:$0xff] %vm322_vm1, %v321_v12 }
 0x278   :  { %328 = vsyncpa [#allocation4], 1 }
 0x279   :  { %329 = vsyncpa [#allocation6], 1 }

</bundles_post_ra>
